<compile_context>
chip_gen: v5e
topology: v5e:2x2
jax: 0.10.0
libtpu: 0.0.40
codegen_flags: <defaults>
</compile_context>

<pallas_src>
import functools

import jax
import jax.numpy as jnp
from jax import lax
from jax.experimental import pallas as pl
from jax.experimental.pallas import tpu as pltpu


def _spatial_attn_kernel(x_ref, wqkv_ref, bqkv_ref, wp2_ref, o_ref):
    bb, HW, C = x_ref.shape

    # Fused q/k/v projection: one (bb*HW, C) x (C, 3C) matmul, f32 accumulate.
    x2 = x_ref[...].reshape(bb * HW, C)                                  # bf16
    y = jnp.dot(x2, wqkv_ref[...], preferred_element_type=jnp.float32)
    y = y + bqkv_ref[0, :]                                               # (bb*HW, 3C) f32

    wp2 = wp2_ref[...]                                                   # (HW, HW) bf16

    # Attention per batch element.  bb is a small static constant, so this
    # Python loop is fully unrolled (equivalent to fori_loop(unroll=True)).
    for b in range(bb):
        yb = y[b * HW:(b + 1) * HW, :]
        q = yb[:, :C].astype(jnp.bfloat16)
        k = yb[:, C:2 * C].astype(jnp.bfloat16)
        v = yb[:, 2 * C:3 * C].astype(jnp.bfloat16)

        # scores = q @ k^T without materializing k.T (contract last dims).
        s = lax.dot_general(q, k,
                            dimension_numbers=(((1,), (1,)), ((), ())),
                            preferred_element_type=jnp.float32)          # (HW, HW)

        # Numerically-stable softmax; reciprocal goes to the EUP slot.
        m = jnp.max(s, axis=-1, keepdims=True)
        p = jnp.exp(s - m)
        p = p * pl.reciprocal(jnp.sum(p, axis=-1, keepdims=True), approx=True)

        qkv = jnp.dot(p.astype(jnp.bfloat16), v,
                      preferred_element_type=jnp.float32)                # (HW, C)

        # z[m, c] = sum_s wp2[m, s] * qkv[s, c]
        z = jnp.dot(wp2, qkv.astype(jnp.bfloat16),
                    preferred_element_type=jnp.float32)                  # (HW, C)
        o_ref[b] = z.astype(o_ref.dtype)


@functools.partial(jax.jit, static_argnames=("H", "W", "bb"))
def spatial_attention_linear(x, wq, bq, wk, bk, wv, bv, weights_param, *, H, W, bb=1):
    """x: (B, H, W, C) float32.  Returns (B, H, W, C) float32."""
    B, Hx, Wx, C = x.shape
    assert (Hx, Wx) == (H, W)
    assert B % bb == 0
    HW = H * W

    # ---- wrapper-side layout fixes (one-time, outside the kernel) ----
    x_flat = x.reshape(B, HW, C).astype(jnp.bfloat16)
    # Linear weights are stored already transposed as (in=C, out=C); fuse q/k/v.
    wqkv = jnp.concatenate([wq, wk, wv], axis=1).astype(jnp.bfloat16)    # (C, 3C)
    bqkv = jnp.concatenate([bq, bk, bv]).reshape(1, 3 * C)               # (1, 3C) f32
    # wp2[h*W + w, s] = weights_param[h, s, w]
    wp2 = jnp.transpose(weights_param, (0, 2, 1)).reshape(HW, HW).astype(jnp.bfloat16)

    out_flat = pl.pallas_call(
        _spatial_attn_kernel,
        out_shape=jax.ShapeDtypeStruct((B, HW, C), jnp.float32),
        grid_spec=pltpu.PrefetchScalarGridSpec(
            num_scalar_prefetch=0,
            grid=(B // bb,),
            in_specs=[
                pl.BlockSpec((bb, HW, C), lambda i: (i, 0, 0)),   # x (bf16)
                pl.BlockSpec((C, 3 * C), lambda i: (0, 0)),       # fused W_qkv (bf16)
                pl.BlockSpec((1, 3 * C), lambda i: (0, 0)),       # fused b_qkv (f32)
                pl.BlockSpec((HW, HW), lambda i: (0, 0)),         # wp2 (bf16)
            ],
            out_specs=pl.BlockSpec((bb, HW, C), lambda i: (i, 0, 0)),
        ),
        compiler_params=pltpu.CompilerParams(
            dimension_semantics=("parallel",),
        ),
    )(x_flat, wqkv, bqkv, wp2)

    # Free relayout-less reshape back to (B, H, W, C).
    return out_flat.reshape(B, H, W, C)


def _reference(x, wq, bq, wk, bk, wv, bv, weights_param):
    """Pure-JAX f32 reference matching the PyTorch forward."""
    B, H, W, C = x.shape
    xf = x.reshape(B, H * W, C)
    q = xf @ wq + bq
    k = xf @ wk + bk
    v = xf @ wv + bv
    s = jnp.einsum("bqc,bkc->bqk", q, k)
    p = jax.nn.softmax(s, axis=-1)
    qkv = jnp.einsum("bqk,bkc->bqc", p, v)
    z = jnp.einsum("bsc,hsw->bhwc", qkv, weights_param)
    return z


if __name__ == "__main__":
    B, H, W, C = 2, 8, 8, 32

    key = jax.random.PRNGKey(0)
    kx, kq, kbq, kk, kbk, kv, kbv, kw = jax.random.split(key, 8)

    x = jax.random.normal(kx, (B, H, W, C), dtype=jnp.float32)
    # Deterministic parameter init (shapes match the lazily-built torch module).
    # Linear weights stored already transposed: (in=C, out=C).
    wq = jax.random.normal(kq, (C, C), dtype=jnp.float32) * 0.1
    bq = jax.random.normal(kbq, (C,), dtype=jnp.float32) * 0.1
    wk = jax.random.normal(kk, (C, C), dtype=jnp.float32) * 0.1
    bk = jax.random.normal(kbk, (C,), dtype=jnp.float32) * 0.1
    wv = jax.random.normal(kv, (C, C), dtype=jnp.float32) * 0.1
    bv = jax.random.normal(kbv, (C,), dtype=jnp.float32) * 0.1
    weights_param = jax.random.normal(kw, (H, H * W, W), dtype=jnp.float32)

    ref = _reference(x, wq, bq, wk, bk, wv, bv, weights_param)
    scale = float(jnp.max(jnp.abs(ref)))

    # bb=1: grid parallel over B (v7x-friendly default).
    out = spatial_attention_linear(x, wq, bq, wk, bk, wv, bv, weights_param, H=H, W=W, bb=1)
    out = jax.block_until_ready(out)
    assert out.shape == (B, H, W, C), out.shape
    err = float(jnp.max(jnp.abs(out - ref)))
    # bf16 MXU inputs with f32 accumulation: compare against f32 reference with
    # a bf16-aware tolerance (a wrong kernel would be O(1) relative error).
    assert err <= 4e-2 * scale, (err, scale)

    # bb=B: one big grid step (the v5e/v6e per-step-overhead-amortizing variant).
    out_b = spatial_attention_linear(x, wq, bq, wk, bk, wv, bv, weights_param, H=H, W=W, bb=B)
    out_b = jax.block_until_ready(out_b)
    err_b = float(jnp.max(jnp.abs(out_b - ref)))
    assert err_b <= 4e-2 * scale, (err_b, scale)

    print("KERNEL_OK")
</pallas_src>

<mosaic_0001>
module attributes {stable_mosaic.version = 11 : i64} {
  func.func @_spatial_attn_kernel(%arg0: i32, %arg1: memref<1x64x32xbf16, #tpu.memory_space<vmem>>, %arg2: memref<32x96xbf16, #tpu.memory_space<vmem>>, %arg3: memref<1x96xf32, #tpu.memory_space<vmem>>, %arg4: memref<64x64xbf16, #tpu.memory_space<vmem>>, %arg5: memref<1x64x32xf32, #tpu.memory_space<vmem>>) attributes {dimension_semantics = [#tpu.dimension_semantics<parallel>], iteration_bounds = array<i64: 2>, scalar_prefetch = 0 : i64, scratch_operands = 0 : i64, tpu.core_type = #tpu.core_type<tc>, window_params = [{transform_indices = @transform_0, window_bounds = array<i64: 1, 64, 32>}, {pipeline_mode = #tpu.pipeline_mode<synchronous>, transform_indices = @transform_1, window_bounds = array<i64: 32, 96>}, {pipeline_mode = #tpu.pipeline_mode<synchronous>, transform_indices = @transform_2, window_bounds = array<i64: 1, 96>}, {pipeline_mode = #tpu.pipeline_mode<synchronous>, transform_indices = @transform_3, window_bounds = array<i64: 64, 64>}, {transform_indices = @transform_4, window_bounds = array<i64: 1, 64, 32>}]} {
    %c0 = arith.constant 0 : index
    %c0_0 = arith.constant 0 : index
    %c0_1 = arith.constant 0 : index
    %0 = vector.load %arg1[%c0, %c0_0, %c0_1] : memref<1x64x32xbf16, #tpu.memory_space<vmem>>, vector<1x64x32xbf16>
    %1 = vector.shape_cast %0 : vector<1x64x32xbf16> to vector<64x32xbf16>
    %c0_2 = arith.constant 0 : index
    %c0_3 = arith.constant 0 : index
    %2 = vector.load %arg2[%c0_2, %c0_3] : memref<32x96xbf16, #tpu.memory_space<vmem>>, vector<32x96xbf16>
    %cst = arith.constant dense<0.000000e+00> : vector<64x96xf32>
    %3 = tpu.matmul %1, %2, %cst {dimension_numbers = #tpu.dot_dimension_numbers<[1], [0], [0], [1], [0, 0, 1, 1], [], []>} : vector<64x32xbf16>, vector<32x96xbf16>, vector<64x96xf32> -> vector<64x96xf32>
    %c0_4 = arith.constant 0 : index
    %c0_5 = arith.constant 0 : index
    %4 = vector.load %arg3[%c0_4, %c0_5] : memref<1x96xf32, #tpu.memory_space<vmem>>, vector<1x96xf32>
    %5 = vector.shape_cast %4 : vector<1x96xf32> to vector<96xf32>
    %6 = vector.shape_cast %5 : vector<96xf32> to vector<1x96xf32>
    %7 = vector.broadcast %6 : vector<1x96xf32> to vector<64x96xf32>
    %8 = arith.addf %3, %7 : vector<64x96xf32>
    %c0_6 = arith.constant 0 : index
    %c0_7 = arith.constant 0 : index
    %9 = vector.load %arg4[%c0_6, %c0_7] : memref<64x64xbf16, #tpu.memory_space<vmem>>, vector<64x64xbf16>
    %10 = vector.extract_strided_slice %8 {offsets = [0, 0], sizes = [64, 32], strides = [1, 1]} : vector<64x96xf32> to vector<64x32xf32>
    %11 = arith.truncf %10 : vector<64x32xf32> to vector<64x32xbf16>
    %12 = vector.extract_strided_slice %8 {offsets = [0, 32], sizes = [64, 32], strides = [1, 1]} : vector<64x96xf32> to vector<64x32xf32>
    %13 = arith.truncf %12 : vector<64x32xf32> to vector<64x32xbf16>
    %14 = vector.extract_strided_slice %8 {offsets = [0, 64], sizes = [64, 32], strides = [1, 1]} : vector<64x96xf32> to vector<64x32xf32>
    %15 = arith.truncf %14 : vector<64x32xf32> to vector<64x32xbf16>
    %cst_8 = arith.constant dense<0.000000e+00> : vector<64x64xf32>
    %16 = tpu.matmul %11, %13, %cst_8 {dimension_numbers = #tpu.dot_dimension_numbers<[1], [1], [0], [0], [0, 0, 1, 0], [], []>} : vector<64x32xbf16>, vector<64x32xbf16>, vector<64x64xf32> -> vector<64x64xf32>
    %cst_9 = arith.constant dense<0xFF800000> : vector<64xf32>
    %17 = vector.multi_reduction <maximumf>, %16, %cst_9 [1] : vector<64x64xf32> to vector<64xf32>
    %18 = vector.shape_cast %17 : vector<64xf32> to vector<64x1xf32>
    %19 = vector.broadcast %18 : vector<64x1xf32> to vector<64x64xf32>
    %20 = arith.subf %16, %19 : vector<64x64xf32>
    %21 = math.exp %20 : vector<64x64xf32>
    %cst_10 = arith.constant dense<0.000000e+00> : vector<64xf32>
    %22 = vector.multi_reduction <add>, %21, %cst_10 [1] : vector<64x64xf32> to vector<64xf32>
    %23 = vector.shape_cast %22 : vector<64xf32> to vector<64x1xf32>
    %24 = tpu.reciprocal %23 {approx = true} : vector<64x1xf32> -> vector<64x1xf32>
    %25 = vector.broadcast %24 : vector<64x1xf32> to vector<64x64xf32>
    %26 = arith.mulf %21, %25 : vector<64x64xf32>
    %27 = arith.truncf %26 : vector<64x64xf32> to vector<64x64xbf16>
    %cst_11 = arith.constant dense<0.000000e+00> : vector<64x32xf32>
    %28 = tpu.matmul %27, %15, %cst_11 {dimension_numbers = #tpu.dot_dimension_numbers<[1], [0], [0], [1], [0, 0, 1, 1], [], []>} : vector<64x64xbf16>, vector<64x32xbf16>, vector<64x32xf32> -> vector<64x32xf32>
    %29 = arith.truncf %28 : vector<64x32xf32> to vector<64x32xbf16>
    %cst_12 = arith.constant dense<0.000000e+00> : vector<64x32xf32>
    %30 = tpu.matmul %9, %29, %cst_12 {dimension_numbers = #tpu.dot_dimension_numbers<[1], [0], [0], [1], [0, 0, 1, 1], [], []>} : vector<64x64xbf16>, vector<64x32xbf16>, vector<64x32xf32> -> vector<64x32xf32>
    %c0_13 = arith.constant 0 : index
    %c0_14 = arith.constant 0 : index
    %c0_15 = arith.constant 0 : index
    %31 = vector.load %arg5[%c0_13, %c0_14, %c0_15] : memref<1x64x32xf32, #tpu.memory_space<vmem>>, vector<1x64x32xf32>
    %32 = vector.shape_cast %31 : vector<1x64x32xf32> to vector<64x32xf32>
    %33 = vector.shape_cast %30 : vector<64x32xf32> to vector<1x64x32xf32>
    tpu.vector_store %arg5[%c0_13, %c0_14, %c0_15], %33 {strides = array<i32>} : memref<1x64x32xf32, #tpu.memory_space<vmem>>, vector<1x64x32xf32>,
    return
  }
  func.func @transform_0(%arg0: i32) -> (i32, i32, i32) {
    %c0_i32 = arith.constant 0 : i32
    %c0_i32_0 = arith.constant 0 : i32
    %c0_i32_1 = arith.constant 0 : i32
    return %arg0, %c0_i32, %c0_i32_0 : i32, i32, i32
  }
  func.func @transform_1(%arg0: i32) -> (i32, i32) {
    %c0_i32 = arith.constant 0 : i32
    %c0_i32_0 = arith.constant 0 : i32
    %c0_i32_1 = arith.constant 0 : i32
    return %c0_i32, %c0_i32_0 : i32, i32
  }
  func.func @transform_2(%arg0: i32) -> (i32, i32) {
    %c0_i32 = arith.constant 0 : i32
    %c0_i32_0 = arith.constant 0 : i32
    %c0_i32_1 = arith.constant 0 : i32
    return %c0_i32, %c0_i32_0 : i32, i32
  }
  func.func @transform_3(%arg0: i32) -> (i32, i32) {
    %c0_i32 = arith.constant 0 : i32
    %c0_i32_0 = arith.constant 0 : i32
    %c0_i32_1 = arith.constant 0 : i32
    return %c0_i32, %c0_i32_0 : i32, i32
  }
  func.func @transform_4(%arg0: i32) -> (i32, i32, i32) {
    %c0_i32 = arith.constant 0 : i32
    %c0_i32_0 = arith.constant 0 : i32
    %c0_i32_1 = arith.constant 0 : i32
    return %arg0, %c0_i32, %c0_i32_0 : i32, i32, i32
  }
}

</mosaic_0001>

<bundles_post_ra>
// kernel: spatial_attention_linear.1
= control target key start
LH: loop header
LB: loop body
LE: loop exit
PB: predicated region body
PF: predicated region fallthrough
CT: control target
= control target key end

     0   :  { %9 = vsyncpa [#allocation3], 0  ;;  %s1078_s0 = inlined_call_operand.vmem [shape: bf16[2,64,32], index: 0, kind: input, shape index: {}]   ;;  %s1079_s1 = inlined_call_operand.vmem [shape: bf16[32,96], index: 1, kind: input, shape index: {}]   ;;  %s1080_s2 = inlined_call_operand.vmem [shape: f32[1,96], index: 2, kind: input, shape index: {}]   ;;  %s1081_s3 = inlined_call_operand.vmem [shape: bf16[64,64], index: 3, kind: input, shape index: {}]   ;;  %s1082_s4 = inlined_call_operand.hbm [shape: f32[2,64,32], index: 4, kind: output, shape index: {}]  }
   0x1   :  { %11 = vsyncpa [#allocation3 + $0x1], 0  ;;  %s910_s15 = smov 0   ;;  %s912_s16 = smov 0  }
   0x2   :  { %s914_s17 = smov 0   ;;  %s916_s18 = smov 0  }
   0x3 LB: > { %s931_s19 = sadd.s32 4294967295, %s879_s18   ;;  %s661_s20 = sadd.s32 4294967294, %s879_s18   ;;  %s879_s18 = sphi %s916_s18, %s1088_s18   ;;  %s875_s17 = sphi %s914_s17, %s1087_s17   ;;  %s871_s16 = sphi %s912_s16, %s1086_s16   ;;  %s867_s15 = sphi %s910_s15, %s1085_s15  }
   0x4   : > { %s935_s21 = sadd.s32 1, %s879_s18   ;;  %s113_s22 = sadd.s32 1, %s875_s17 }
   0x5   : > { %s110_s23 = ssub.s32 %s879_s18, %s935_s21  ;;  %p123_p0 = scmp.ne.s32.totalorder %s875_s17, %s871_s16 }
   0x6   : > { %p111_p1 = scmp.eq.s32.totalorder %s110_s23, 0  ;;  %p124_p2 = scmp.eq.s32.totalorder %s931_s19, 1 }
   0x7   : > { %p129_p3 = scmp.ne.s32.totalorder %s871_s16, %s867_s15  ;;  %p130_p4 = scmp.eq.s32.totalorder %s661_s20, 1 }
   0x8   : > { %s946_s24 = scalar_select %p111_p1, %s875_s17, %s113_s22  }
   0x9   : > { %p948_p5 = por %p124_p2, %p123_p0  ;;  %p952_p6 = por %p130_p4, %p129_p3 }
   0xa   : > { %p664_p7 = scmp.ge.s32.totalorder %s879_s18, 1  ;;  %p165_p8 = scmp.lt.s32.totalorder %s879_s18, 3 }
   0xc   : > { %p166_p9 = pnand %p664_p7, %p165_p8 }
   0xd   : > { %p191_p10 = scmp.lt.s32.totalorder (!%p166_p9), %s931_s19, 1  ;;  %s881_s12 = smov (!%p166_p9), 96  }
   0xe   : > { %169 = sbr.rel (%p166_p9) target bundleno = 1185 (0x4a1), region = 36  ;;  %s882_s13 = smov (!%p166_p9), 64  }
   0xf   : > { %s740_s8 = sshll.u32 (!%p166_p9), %s931_s19, 6  ;;  %s837_s27 = scalar_lea.hbm (!%p166_p9), %s1082_s4, 128 }
  0x10   : > { %s595_s11 = scalar_lea.hbm (!%p166_p9), %s1082_s4, %s740_s8 }
  0x13   : > { %v735_v0 = vld [vmem:[%s1079_s1 + $0x8] sm:$0xff]  ;;  %v734_v1 = vld [vmem:[%s1079_s1] sm:$0xff]  ;;  %s192_s5 = scalar_select %p191_p10, %s931_s19, 1  ;;  %vm245_vm0 = vcmask 261120   ;;  %vm364_vm1 = vcmask 523264  }
  0x14   : > { %264 = vmatpush.bf16.msra.mxu0 %v735_v0  ;;  %v784_v9 = vld [vmem:[%s1080_s2] ss:$0 sm:$0xff] }
  0x15   : > { %s729_s6 = sshll.u32 %s192_s5, 5  ;;  %s188_s5 = sand.u32 1, %s871_s16  }
  0x16   : > { %s195_s9 = scalar_lea.vmem %s1078_s0, %s729_s6  ;;  %s665_s6 = sshll.u32 %s188_s5, 6 }
  0x17   : > { %v730_v2 = vld [vmem:[%s195_s9] sm:$0xff]  ;;  %v731_v3 = vld [vmem:[%s195_s9 + $0x8] sm:$0xff]  ;;  %v732_v4 = vld [vmem:[%s195_s9 + $0x10] sm:$0xff]  ;;  %s190_s7 = scalar_lea.vmem [#allocation2], %s665_s6  ;;  %s584_s14 = scalar_lea.sflag [#allocation3], %s188_s5 }
  0x18   : > { %265 = vmatpush.bf16.msra.mxu0 %v734_v1  ;;  %v733_v5 = vld [vmem:[%s195_s9 + $0x18] sm:$0xff] }
  0x1b   : > { %692 = vmatmul.msk.bf16.vlgmr.msra.gmra.mxu0 %vm245_vm0, %v730_v2 }
  0x2b   : > { %693 = vmatmul.msk.bf16.gmra.mxu0 %vm245_vm0, %v731_v3 }
  0x3b   : > { %694 = vmatmul.msk.bf16.gmra.mxu0 %vm245_vm0, %v732_v4 }
  0x4b   : > { %695 = vmatmul.msk.bf16.gmra.mxu0 %vm245_vm0, %v733_v5 }
  0x98   : > { %v267_v6 = vpop.f32.mrf.mxu0 }
  0x99   : > { %v268_v16 = vadd.f32 %v784_v9, %v267_v6 }
  0xa0   : > { %v269_v7 = vpop.f32.mrf.mxu0 }
  0xa1   : > { %v270_v14 = vadd.f32 %v784_v9, %v269_v7 }
  0xa3   : > { %v295_v17 = vpack.c.bf16 %v270_v14, %v268_v16 }
  0xa8   : > { %v272_v8 = vpop.f32.mrf.mxu0 }
  0xa9   : > { %v273_v11 = vadd.f32 %v784_v9, %v272_v8 }
  0xb0   : > { %v274_v10 = vpop.f32.mrf.mxu0 }
  0xb1   : > { %v275_v12 = vadd.f32 %v784_v9, %v274_v10 }
  0xb3   : > { %v976_v13 = vpack.c.bf16 %v275_v12, %v273_v11 }
  0xb5   : > { %305 = vrot.lane.b32.xlu1 %v976_v13, %s881_s12 }
  0xb8   : > { %v277_v15 = vpop.f32.mrf.mxu0 }
  0xb9   : > { %v278_v25 = vadd.f32 %v784_v9, %v277_v15 }
  0xbd   : > { %303 = vrot.lane.b32.xlu1 %v295_v17, %s881_s12 }
  0xc0   : > { %v279_v18 = vpop.f32.mrf.mxu0 }
  0xc1   : > { %v280_v24 = vadd.f32 %v784_v9, %v279_v18 }
  0xc3   : > { %v980_v26 = vpack.c.bf16 %v280_v24, %v278_v25 }
  0xc8   : > { %v282_v19 = vpop.f32.mrf.mxu0 }
  0xc9   : > { %v283_v21 = vadd.f32 %v784_v9, %v282_v19 }
  0xd0   : > { %v284_v20 = vpop.f32.mrf.mxu0 }
  0xd1   : > { %v285_v22 = vadd.f32 %v784_v9, %v284_v20 }
  0xd3   : > { %v298_v23 = vpack.c.bf16 %v285_v22, %v283_v21 }
  0xd5   : > { %463 = vrot.lane.b32.xlu2 %v298_v23, %s882_s13  ;;  %309 = vrot.lane.b32.xlu0 %v298_v23, %s881_s12 }
  0xdd   : > { %307 = vrot.lane.b32.xlu0 %v980_v26, %s881_s12  ;;  %s596_s12 = sshll.u32 %s190_s7, 4  ;;  %s597_s12 = int_to_ptr.vmem [resolvable:$true] %s596_s12 }
 0x127   : > { %v306_v32 = vpop.permute.xlu1 %305 }
 0x128   : > { %v327_v33 = vsel %vm245_vm0, %v306_v32, 0 }
 0x12f   : > { %v464_v27 = vpop.permute.xlu2 %463  ;;  %v304_v34 = vpop.permute.xlu1 %303 }
 0x130   : > { %485 = vmatpush.bf16.msra.mxu2 %v464_v27  ;;  %v324_v35 = vsel %vm245_vm0, %v304_v34, 0 }
 0x147   : > { %v310_v28 = vpop.permute.xlu0 %309 }
 0x148   : > { %v333_v29 = vsel %vm245_vm0, %v310_v28, 0 }
 0x149   : > { %339 = vmatpush.bf16.xpose.msra.mxu1 %v333_v29 }
 0x14f   : > { %v308_v30 = vpop.permute.xlu0 %307 }
 0x150   : > { %v330_v31 = vsel %vm245_vm0, %v308_v30, 0 }
 0x151   : > { %340 = vmatpush.bf16.xpose.msra.mxu1 %v330_v31 }
 0x159   : > { %341 = vmatpush.bf16.xpose.msra.mxu1 %v327_v33 }
 0x161   : > { %342 = vmatpush.bf16.xpose.msra.mxu1 %v324_v35 }
 0x168   : > { %696 = vmatmul.msk.bf16.vlgmr.msra.gmra.mxu1 %vm245_vm0, %v295_v17 }
 0x178   : > { %697 = vmatmul.msk.bf16.gmra.mxu1 %vm245_vm0, %v976_v13 }
 0x188   : > { %698 = vmatmul.msk.bf16.gmra.mxu1 %vm245_vm0, %v980_v26 }
 0x198   : > { %699 = vmatmul.msk.bf16.gmra.mxu1 %vm245_vm0, %v298_v23 }
 0x1e5   : > { %v344_v36 = vpop.f32.mrf.mxu1 }
 0x1e6   : > { %v365_v37 = vsel %vm364_vm1, %v344_v36, -inf }
 0x1e7   : > { %366 = vmax.xlane.f32.xlu2 %v365_v37 }
 0x1ed   : > { %v346_v38 = vpop.f32.mrf.mxu1 }
 0x1ee   : > { %v368_v39 = vsel %vm364_vm1, %v346_v38, -inf }
 0x1ef   : > { %369 = vmax.xlane.f32.xlu2 %v368_v39 }
 0x1f5   : > { %v349_v40 = vpop.f32.mrf.mxu1 }
 0x1f6   : > { %v371_v41 = vsel %vm364_vm1, %v349_v40, -inf }
 0x1f7   : > { %372 = vmax.xlane.f32.xlu0 %v371_v41 }
 0x1fd   : > { %v351_v42 = vpop.f32.mrf.mxu1 }
 0x1fe   : > { %v374_v43 = vsel %vm364_vm1, %v351_v42, -inf }
 0x1ff   : > { %375 = vmax.xlane.f32.xlu1 %v374_v43 }
 0x205   : > { %v354_v44 = vpop.f32.mrf.mxu1 }
 0x206   : > { %v377_v45 = vsel %vm364_vm1, %v354_v44, -inf }
 0x207   : > { %378 = vmax.xlane.f32.xlu2 %v377_v45 }
 0x20d   : > { %v356_v46 = vpop.f32.mrf.mxu1 }
 0x20e   : > { %v380_v47 = vsel %vm364_vm1, %v356_v46, -inf }
 0x20f   : > { %381 = vmax.xlane.f32.xlu2 %v380_v47 }
 0x215   : > { %v359_v48 = vpop.f32.mrf.mxu1 }
 0x216   : > { %v383_v49 = vsel %vm364_vm1, %v359_v48, -inf }
 0x217   : > { %384 = vmax.xlane.f32.xlu2 %v383_v49 }
 0x21d   : > { %v361_v50 = vpop.f32.mrf.mxu1 }
 0x21e   : > { %v386_v51 = vsel %vm364_vm1, %v361_v50, -inf }
 0x21f   : > { %387 = vmax.xlane.f32.xlu2 %v386_v51 }
 0x237   : > { %457 = vrot.lane.b32.xlu2 %v295_v17, %s882_s13 }
 0x25a   : > { %v367_v52 = vpop.xlane.xlu2 %366 }
 0x25b   : > { %v389_v53 = vsub.f32 %v344_v36, %v367_v52 }
 0x25d   : > { %v397_v54 = vmul.f32 1.442695, %v389_v53 }
 0x25f   : > { %785 = vpow2.f32 %v397_v54 }
 0x262   : > { %v370_v55 = vpop.xlane.xlu2 %369 }
 0x263   : > { %v390_v56 = vsub.f32 %v346_v38, %v370_v55 }
 0x265   : > { %v1002_v57 = vpop.eup %785  ;;  %v399_v58 = vmul.f32 1.442695, %v390_v56 }
 0x266   : > { %v413_v59 = vsel %vm364_vm1, %v1002_v57, 0.0 }
 0x267   : > { %787 = vpow2.f32 %v399_v58  ;;  %414 = vadd.xlane.f32.xlu0 %v413_v59 }
 0x26a   : > { %v373_v60 = vpop.xlane.xlu0 %372 }
 0x26b   : > { %v391_v61 = vsub.f32 %v349_v40, %v373_v60 }
 0x26d   : > { %v788_v62 = vpop.eup %787  ;;  %v401_v63 = vmul.f32 1.442695, %v391_v61 }
 0x26e   : > { %v416_v0 = vsel %vm364_vm1, %v788_v62, 0.0 }
 0x26f   : > { %789 = vpow2.f32 %v401_v63  ;;  %417 = vadd.xlane.f32.xlu1 %v416_v0 }
 0x272   : > { %v376_v10 = vpop.xlane.xlu1 %375 }
 0x273   : > { %v392_v12 = vsub.f32 %v351_v42, %v376_v10  ;;  %v739_v10 = vld [vmem:[%s1081_s3 + $0x18] sm:$0xff] }
 0x275   : > { %v790_v1 = vpop.eup %789  ;;  %v403_v16 = vmul.f32 1.442695, %v392_v12 }
 0x276   : > { %v419_v2 = vsel %vm364_vm1, %v790_v1, 0.0 }
 0x277   : > { %420 = vadd.xlane.f32.xlu2 %v419_v2 }
 0x27a   : > { %v379_v3 = vpop.xlane.xlu2 %378 }
 0x27b   : > { %461 = vrot.lane.b32.xlu0 %v980_v26, %s882_s13 }
 0x282   : > { %v382_v4 = vpop.xlane.xlu2 %381 }
 0x283   : > { %v394_v5 = vsub.f32 %v356_v46, %v382_v4 }
 0x285   : > { %v407_v6 = vmul.f32 1.442695, %v394_v5 }
 0x287   : > { %791 = vpow2.f32 %v407_v6 }
 0x288   : > { %459 = vrot.lane.b32.xlu1 %v976_v13, %s882_s13  ;;  %v393_v13 = vsub.f32 %v354_v44, %v379_v3  ;;  %s598_s13 = sshll.u32 %s595_s11, 4  ;;  %s599_s13 = int_to_ptr.hbm [resolvable:$true] %s598_s13 }
 0x289   : > { %s831_s20 = sshra.s32 %s599_s13, 4  ;;  %s832_s20 = int_to_ptr.hbm [resolvable:$true] %s831_s20 }
 0x28a   : > { %v385_v7 = vpop.xlane.xlu2 %384  ;;  %v405_v22 = vmul.f32 1.442695, %v393_v13  ;;  %s833_s22 = scalar_lea.hbm %s832_s20, 64  ;;  %p838_p0 = scmp.lt.s32.totalorder %s832_s20, %s1082_s4 }
 0x28b   : > { %v395_v17 = vsub.f32 %v359_v48, %v385_v7  ;;  %v736_v7 = vld [vmem:[%s1081_s3] sm:$0xff]  ;;  %p834_p11 = scmp.ne.s32.totalorder %s832_s20, %s833_s22  ;;  %p839_p1 = scmp.lt.s32.totalorder %s837_s27, %s833_s22 }
 0x28d   : > { %v792_v8 = vpop.eup %791  ;;  %v409_v20 = vmul.f32 1.442695, %v395_v17  ;;  %p835_p12 = pnand %p834_p11, %p948_p5  ;;  %p840_p2 = por %p839_p1, %p838_p0 }
 0x28e   : > { %v428_v9 = vsel %vm364_vm1, %v792_v8, 0.0 }
 0x28f   : > { %429 = vadd.xlane.f32.xlu2 %v428_v9  ;;  %v738_v9 = vld [vmem:[%s1081_s3 + $0x10] sm:$0xff]  ;;  %p836_p13 = pneg %p835_p12 }
 0x291   : > { %p841_p3 = pnand %p840_p2, %p836_p13 }
 0x292   : > { %v388_v11 = vpop.xlane.xlu2 %387 }
 0x293   : > { %v396_v14 = vsub.f32 %v361_v50, %v388_v11 }
 0x295   : > { %v411_v15 = vmul.f32 1.442695, %v396_v14 }
 0x297   : > { %793 = vpow2.f32 %v411_v15 }
 0x298   : > { %795 = vpow2.f32 %v403_v16 }
 0x299   : > { %797 = vpow2.f32 %v409_v20 }
 0x29a   : > { %799 = vpow2.f32 %v405_v22  ;;  %v458_v35 = vpop.permute.xlu2 %457 }
 0x29d   : > { %v794_v18 = vpop.eup %793 }
 0x29e   : > { %v434_v19 = vsel %vm364_vm1, %v794_v18, 0.0  ;;  %v796_v21 = vpop.eup %795 }
 0x29f   : > { %435 = vadd.xlane.f32.xlu2 %v434_v19  ;;  %v422_v23 = vsel %vm364_vm1, %v796_v21, 0.0  ;;  %v798_v24 = vpop.eup %797 }
 0x2a0   : > { %v431_v25 = vsel %vm364_vm1, %v798_v24, 0.0  ;;  %v800_v26 = vpop.eup %799 }
 0x2a1   : > { %v425_v27 = vsel %vm364_vm1, %v800_v26, 0.0 }
 0x2a5   : > { %423 = vadd.xlane.f32.xlu0 %v422_v23 }
 0x2ad   : > { %432 = vadd.xlane.f32.xlu0 %v431_v25 }
 0x2b2   : > { %426 = vadd.xlane.f32.xlu1 %v425_v27 }
 0x2da   : > { %v415_v28 = vpop.xlane.xlu0 %414 }
 0x2e2   : > { %v418_v30 = vpop.xlane.xlu1 %417 }
 0x2e3   : > { %801 = vrcp.f32 %v418_v30 }
 0x2e4   : > { %803 = vrcp.f32 %v415_v28 }
 0x2e9   : > { %v802_v31 = vpop.eup %801 }
 0x2ea   : > { %v804_v33 = vpop.eup %803  ;;  %v446_v34 = vmul.f32 %v802_v31, %v788_v62  ;;  %v421_v38 = vpop.xlane.xlu2 %420 }
 0x2eb   : > { %v445_v36 = vmul.f32 %v804_v33, %v1002_v57  ;;  %805 = vrcp.f32 %v421_v38 }
 0x2ed   : > { %v462_v29 = vpop.permute.xlu0 %461  ;;  %v453_v37 = vpack.c.bf16 %v446_v34, %v445_v36 }
 0x2ee   : > { %486 = vmatpush.bf16.msra.mxu2 %v462_v29 }
 0x2f1   : > { %v806_v40 = vpop.eup %805 }
 0x2f2   : > { %v447_v42 = vmul.f32 %v806_v40, %v790_v1 }
 0x2fa   : > { %v460_v32 = vpop.permute.xlu1 %459 }
 0x2fb   : > { %487 = vmatpush.bf16.msra.mxu2 %v460_v32 }
 0x2ff   : > { %488 = vmatpush.bf16.msra.mxu2 %v458_v35 }
 0x302   : > { %700 = vmatmul.msk.bf16.vlgmr.msra.gmra.mxu2 %vm364_vm1, %v453_v37  ;;  %v430_v45 = vpop.xlane.xlu2 %429 }
 0x312   : > { %v436_v53 = vpop.xlane.xlu2 %435 }
 0x318   : > { %v424_v39 = vpop.xlane.xlu0 %423 }
 0x319   : > { %807 = vrcp.f32 %v424_v39 }
 0x31f   : > { %v808_v41 = vpop.eup %807 }
 0x320   : > { %v448_v43 = vmul.f32 %v808_v41, %v796_v21  ;;  %v433_v51 = vpop.xlane.xlu0 %432 }
 0x322   : > { %v454_v44 = vpack.c.bf16 %v448_v43, %v447_v42 }
 0x324   : > { %701 = vmatmul.msk.bf16.gmra.mxu2 %vm364_vm1, %v454_v44 }
 0x325   : > { %v427_v46 = vpop.xlane.xlu1 %426 }
 0x326   : > { %809 = vrcp.f32 %v427_v46 }
 0x327   : > { %811 = vrcp.f32 %v430_v45 }
 0x328   : > { %813 = vrcp.f32 %v433_v51 }
 0x329   : > { %815 = vrcp.f32 %v436_v53 }
 0x32c   : > { %v810_v47 = vpop.eup %809 }
 0x32d   : > { %v812_v48 = vpop.eup %811  ;;  %v449_v49 = vmul.f32 %v810_v47, %v800_v26 }
 0x32e   : > { %v450_v50 = vmul.f32 %v812_v48, %v792_v8  ;;  %v814_v54 = vpop.eup %813  ;;  %v737_v8 = vld [vmem:[%s1081_s3 + $0x8] sm:$0xff] }
 0x32f   : > { %v816_v55 = vpop.eup %815  ;;  %v451_v56 = vmul.f32 %v814_v54, %v798_v24 }
 0x330   : > { %v455_v52 = vpack.c.bf16 %v450_v50, %v449_v49  ;;  %v452_v57 = vmul.f32 %v816_v55, %v794_v18 }
 0x332   : > { %v456_v58 = vpack.c.bf16 %v452_v57, %v451_v56 }
 0x334   : > { %702 = vmatmul.msk.bf16.gmra.mxu2 %vm364_vm1, %v455_v52 }
 0x344   : > { %703 = vmatmul.msk.bf16.gmra.mxu2 %vm364_vm1, %v456_v58 }
 0x385   : > { %v490_v59 = vpop.f32.mrf.mxu2 }
 0x38d   : > { %v492_v60 = vpop.f32.mrf.mxu2 }
 0x38e   : > { %v510_v6 = vpack.c.bf16 %v492_v60, %v490_v59 }
 0x3a7   : > { %v495_v61 = vpop.f32.mrf.mxu2 }
 0x3af   : > { %v497_v62 = vpop.f32.mrf.mxu2 }
 0x3b0   : > { %v511_v5 = vpack.c.bf16 %v497_v62, %v495_v61 }
 0x3b7   : > { %v500_v63 = vpop.f32.mrf.mxu2 }
 0x3bf   : > { %v502_v0 = vpop.f32.mrf.mxu2 }
 0x3c0   : > { %v512_v4 = vpack.c.bf16 %v502_v0, %v500_v63 }
 0x3c7   : > { %v505_v1 = vpop.f32.mrf.mxu2 }
 0x3cf   : > { %v507_v2 = vpop.f32.mrf.mxu2 }
 0x3d0   : > { %v513_v3 = vpack.c.bf16 %v507_v2, %v505_v1 }
 0x3d2   : > { %550 = vmatpush.bf16.msra.mxu3 %v513_v3 }
 0x3d6   : > { %551 = vmatpush.bf16.msra.mxu3 %v512_v4 }
 0x3da   : > { %552 = vmatpush.bf16.msra.mxu3 %v511_v5 }
 0x3de   : > { %553 = vmatpush.bf16.msra.mxu3 %v510_v6 }
 0x3e1   : > { %720 = vmatmul.msk.bf16.vlgmr.msra.gmra.mxu3 %vm364_vm1, %v736_v7 }
 0x3f1   : > { %721 = vmatmul.msk.bf16.gmra.mxu3 %vm364_vm1, %v737_v8 }
 0x401   : > { %722 = vmatmul.msk.bf16.gmra.mxu3 %vm364_vm1, %v738_v9 }
 0x411   : > { %723 = vmatmul.msk.bf16.gmra.mxu3 %vm364_vm1, %v739_v10 }
 0x464   : > { %v555_v11 = vpop.f32.mrf.mxu3 }
 0x465   : > { %575 = vst.msk [vmem:[%s190_s7] sm:$0xff] %vm245_vm0, %v555_v11 }
 0x46c   : > { %v557_v12 = vpop.f32.mrf.mxu3 }
 0x46d   : > { %576 = vst.msk [vmem:[%s190_s7 + $0x8] sm:$0xff] %vm245_vm0, %v557_v12 }
 0x474   : > { %v560_v14 = vpop.f32.mrf.mxu3 }
 0x475   : > { %577 = vst.msk [vmem:[%s190_s7 + $0x10] sm:$0xff] %vm245_vm0, %v560_v14 }
 0x47c   : > { %v562_v15 = vpop.f32.mrf.mxu3 }
 0x47d   : > { %578 = vst.msk [vmem:[%s190_s7 + $0x18] sm:$0xff] %vm245_vm0, %v562_v15 }
 0x484   : > { %v565_v16 = vpop.f32.mrf.mxu3 }
 0x485   : > { %579 = vst.msk [vmem:[%s190_s7 + $0x20] sm:$0xff] %vm245_vm0, %v565_v16 }
 0x48c   : > { %v567_v17 = vpop.f32.mrf.mxu3 }
 0x48d   : > { %580 = vst.msk [vmem:[%s190_s7 + $0x28] sm:$0xff] %vm245_vm0, %v567_v17 }
 0x494   : > { %v570_v18 = vpop.f32.mrf.mxu3 }
 0x495   : > { %581 = vst.msk [vmem:[%s190_s7 + $0x30] sm:$0xff] %vm245_vm0, %v570_v18 }
 0x49c   : > { %v572_v19 = vpop.f32.mrf.mxu3 }
 0x49d   : > { %582 = vst.msk [vmem:[%s190_s7 + $0x38] sm:$0xff] %vm245_vm0, %v572_v19 }
 0x49e   : > { %844 = shalt.err (!%p841_p3)
}
 0x49f   : > { %s883_s30 = smov 128   ;;  %s884_s5 = smov 8  }
 0x4a0   : > { %741 = dma.vmem_to_hbm [thread:$0]  (%p948_p5), %s597_s12, 1024, %s599_s13, %s584_s14, %s883_s30, %s883_s30, %s884_s5  }
 0x4a1 PF: > { %p747_p4 = scmp.ge.s32.totalorder %s879_s18, 2  ;;  %s613_s6 = sand.u32 1, %s867_s15  }
 0x4a2   : > { %s614_s7 = scalar_lea.sflag [#allocation3], %s613_s6 }
 0x4a3   : > { %p744_p7 = pnand %p747_p4, %p952_p6 }
 0x4a5   : > { %p745_p8 = pneg %p744_p7 }
 0x4a7   : > { %862 = dma.done.wait (%p745_p8), %s614_s7, 1024  }
 0x4a8   : > { %864 = vsyncadd (%p745_p8), %s614_s7, 4294966272  ;;  %p14_p9 = scmp.ge.s32.totalorder %s935_s21, 4   ;;  %s1085_s15 = smov %s871_s16 }
 0x4a9   : > { %s1086_s16 = smov %s875_s17  ;;  %s1087_s17 = smov %s946_s24 }
 0x4aa   : > { %s1088_s18 = smov %s935_s21  ;;  %16 = sbr.rel (!%p14_p9) target bundleno = 3 (0x3), region = 71 }
 0x4af   :  { %620 = vsyncpa [#allocation3], 1 }
 0x4b0   :  { %622 = vsyncpa [#allocation3 + $0x1], 1 }

</bundles_post_ra>
